<compile_context>
chip_gen: v7x
topology: tpu7x:2x2x1
jax: 0.10.0
libtpu: 0.0.40
codegen_flags: <defaults>
</compile_context>

<pallas_src>
import math
import jax
import jax.numpy as jnp
from jax.experimental import pallas as pl
from jax.experimental.pallas import tpu as pltpu

_C = math.sqrt(2.0 / math.pi)


def gelu_kernel(x_ref, o_ref):
    # Upcast to f32 for the polynomial + tanh (v5e has no bf16 VPU/EUP path);
    # cast back on store so HBM traffic stays in the I/O dtype.
    x = x_ref[...].astype(jnp.float32)
    inner = _C * x * (1.0 + 0.044715 * (x * x))   # one fewer VALU mul than x**3
    y = 0.5 * x * (1.0 + jnp.tanh(inner))          # tanh -> EUP slot
    o_ref[...] = y.astype(o_ref.dtype)


def _sublane_multiple(dtype):
    itemsize = jnp.dtype(dtype).itemsize
    return max(8, 32 // itemsize)   # 8 for f32, 16 for bf16, 32 for int8/fp8


def gelu_pallas_flat(x_flat):
    """GELU on a 1-D array; returns a 1-D array of the same length/dtype."""
    n = x_flat.shape[0]
    dtype = x_flat.dtype
    itemsize = jnp.dtype(dtype).itemsize
    sub = _sublane_multiple(dtype)

    # Lane-dense last dim: a wide multiple of 128 avoids masked partial stores.
    lane_w = 1024 if n >= 1024 else 128
    rows = pl.cdiv(n, lane_w)

    # ~2 MiB blocks (per buffer).
    target_block_bytes = 2 * 1024 * 1024
    target_rows = max(sub, (target_block_bytes // (lane_w * itemsize)) // sub * sub)

    if rows <= target_rows:
        if rows >= 2 * sub:
            # Split into (at least) 2 grid steps so both v7x TensorCores work.
            br = pl.cdiv(pl.cdiv(rows, 2), sub) * sub
        else:
            br = rows   # block == full array extent -> always a legal block
    else:
        br = target_rows

    grid_r = pl.cdiv(rows, br)
    rows_padded = grid_r * br
    n_padded = rows_padded * lane_w

    if n_padded != n:
        x_flat = jnp.pad(x_flat, (0, n_padded - n))   # GELU(0) == 0, safe

    x2 = x_flat.reshape(rows_padded, lane_w)

    cost = pl.CostEstimate(
        flops=8 * n_padded,
        transcendentals=n_padded,
        bytes_accessed=2 * n_padded * itemsize,
    )

    out = pl.pallas_call(
        gelu_kernel,
        out_shape=jax.ShapeDtypeStruct((rows_padded, lane_w), dtype),
        grid=(grid_r,),
        in_specs=[pl.BlockSpec((br, lane_w), lambda i: (i, 0))],
        out_specs=pl.BlockSpec((br, lane_w), lambda i: (i, 0)),
        compiler_params=pltpu.CompilerParams(
            dimension_semantics=("parallel",)),
        cost_estimate=cost,
    )(x2)

    out_flat = out.reshape(-1)
    if n_padded != n:
        out_flat = out_flat[:n]
    return out_flat


def gelu(x):
    """Accepts any shape; elementwise, so flatten -> lane-dense kernel -> restore."""
    orig_shape = x.shape
    out_flat = gelu_pallas_flat(x.reshape(-1))
    return out_flat.reshape(orig_shape)


def gelu_ref(x):
    xf = x.astype(jnp.float32)
    y = 0.5 * xf * (1.0 + jnp.tanh(_C * (xf + 0.044715 * jnp.power(xf, 3))))
    return y.astype(x.dtype)


if __name__ == "__main__":
    key = jax.random.PRNGKey(0)

    # 1) Small transformer-ish activation: [batch, seq, hidden]
    x = jax.random.normal(key, (2, 8, 32), dtype=jnp.float32)
    out = jax.block_until_ready(gelu(x))
    ref = gelu_ref(x)
    assert out.shape == x.shape and out.dtype == x.dtype
    assert jnp.allclose(out, ref, atol=1e-5, rtol=1e-5)

    # 2) Multi-block path (grid >= 2, lane_w = 1024, no padding)
    k2 = jax.random.PRNGKey(1)
    x2 = jax.random.normal(k2, (4, 128, 1024), dtype=jnp.float32)
    out2 = jax.block_until_ready(gelu(x2))
    assert jnp.allclose(out2, gelu_ref(x2), atol=1e-5, rtol=1e-5)

    # 3) Ragged shape exercising the pad/slice path
    k3 = jax.random.PRNGKey(2)
    x3 = jax.random.normal(k3, (3, 100, 7), dtype=jnp.float32)
    out3 = jax.block_until_ready(gelu(x3))
    assert jnp.allclose(out3, gelu_ref(x3), atol=1e-5, rtol=1e-5)

    print("KERNEL_OK")
</pallas_src>

<mosaic_0001>
module attributes {stable_mosaic.version = 11 : i64} {
  func.func @gelu_kernel(%arg0: i32, %arg1: memref<4x128xf32, #tpu.memory_space<vmem>>, %arg2: memref<4x128xf32, #tpu.memory_space<vmem>>) attributes {dimension_semantics = [#tpu.dimension_semantics<parallel>], iteration_bounds = array<i64: 1>, scalar_prefetch = 0 : i64, scratch_operands = 0 : i64, tpu.core_type = #tpu.core_type<tc>, window_params = [{transform_indices = @transform_0, window_bounds = array<i64: 4, 128>}, {transform_indices = @transform_1, window_bounds = array<i64: 4, 128>}]} {
    %c0 = arith.constant 0 : index
    %c0_0 = arith.constant 0 : index
    %0 = vector.load %arg1[%c0, %c0_0] : memref<4x128xf32, #tpu.memory_space<vmem>>, vector<4x128xf32>
    %cst = arith.constant 0.797884583 : f32
    %1 = vector.broadcast %cst : f32 to vector<4x128xf32>
    %2 = arith.mulf %1, %0 : vector<4x128xf32>
    %3 = arith.mulf %0, %0 : vector<4x128xf32>
    %cst_1 = arith.constant 4.471500e-02 : f32
    %4 = vector.broadcast %cst_1 : f32 to vector<4x128xf32>
    %5 = arith.mulf %4, %3 : vector<4x128xf32>
    %cst_2 = arith.constant 1.000000e+00 : f32
    %6 = vector.broadcast %cst_2 : f32 to vector<4x128xf32>
    %7 = arith.addf %6, %5 : vector<4x128xf32>
    %8 = arith.mulf %2, %7 : vector<4x128xf32>
    %cst_3 = arith.constant 5.000000e-01 : f32
    %9 = vector.broadcast %cst_3 : f32 to vector<4x128xf32>
    %10 = arith.mulf %9, %0 : vector<4x128xf32>
    %11 = math.tanh %8 : vector<4x128xf32>
    %cst_4 = arith.constant 1.000000e+00 : f32
    %12 = vector.broadcast %cst_4 : f32 to vector<4x128xf32>
    %13 = arith.addf %12, %11 : vector<4x128xf32>
    %14 = arith.mulf %10, %13 : vector<4x128xf32>
    %c0_5 = arith.constant 0 : index
    %c0_6 = arith.constant 0 : index
    %15 = vector.load %arg2[%c0_5, %c0_6] : memref<4x128xf32, #tpu.memory_space<vmem>>, vector<4x128xf32>
    tpu.vector_store %arg2[%c0_5, %c0_6], %14 {strides = array<i32>} : memref<4x128xf32, #tpu.memory_space<vmem>>, vector<4x128xf32>,
    return
  }
  func.func @transform_0(%arg0: i32) -> (i32, i32) {
    %c0_i32 = arith.constant 0 : i32
    %c0_i32_0 = arith.constant 0 : i32
    return %arg0, %c0_i32 : i32, i32
  }
  func.func @transform_1(%arg0: i32) -> (i32, i32) {
    %c0_i32 = arith.constant 0 : i32
    %c0_i32_0 = arith.constant 0 : i32
    return %arg0, %c0_i32 : i32, i32
  }
}

</mosaic_0001>

<bundles_post_ra>
// kernel: tpu_custom_call.1
= control target key start
LH: loop header
LB: loop body
LE: loop exit
PB: predicated region body
PF: predicated region fallthrough
CT: control target
= control target key end

     0   :  { %6 = vsyncpa [#allocation3], 0  ;;  %s135_s0 = inlined_call_operand.hbm [shape: f32[4,128], index: 0, kind: input, shape index: {}]   ;;  %s136_s1 = inlined_call_operand.hbm [shape: f32[4,128], index: 1, kind: output, shape index: {}]  }
   0x1   :  { %7 = vsyncpa [#allocation4], 0  ;;  %s99_s6 = smov [#allocation2]   ;;  %s51_s10 = scalar_lea.hbm %s135_s0, 64 }
   0x2   :  { %s14_s7 = sshll.u32 %s99_s6, 4  ;;  %p52_p0 = scmp.ne.s32.totalorder %s135_s0, %s51_s10  ;;  %s15_s7 = int_to_ptr.vmem [resolvable:$true] %s14_s7 }
   0x3   :  { %p55_p1 = scmp.lt.u32.totalorder %s51_s10, %s135_s0 }
   0x5   :  { %p57_p2 = pnand %p55_p1, %p52_p0 }
   0x7   :  { %60 = shalt.err (!%p57_p2)
}
   0x8   :  { %s61_s15 = scalar_lea.vmem %s15_s7, 64  ;;  %p66_p4 = scmp.lt.s32.totalorder %s15_s7, %s15_s7 }
   0x9   :  { %p62_p3 = scmp.ne.s32.totalorder %s15_s7, %s61_s15  ;;  %p67_p5 = scmp.lt.s32.totalorder %s61_s15, %s61_s15 }
   0xb   :  { %p68_p6 = por %p67_p5, %p66_p4 }
   0xd   :  { %p69_p7 = pnand %p68_p6, %p62_p3 }
   0xf   :  { %72 = shalt.err (!%p69_p7)
}
  0x10   :  { %17 = dma.hbm_to_vmem [thread:$0]  %s135_s0, 64, %s15_s7, [#allocation3]  }
  0x11   :  { %95 = dma.done.wait [#allocation3], 64  }
  0x12   :  { %96 = vsyncadd [#allocation3], 4294967232  ;;  %v21_v0 = vld [vmem:[#allocation2] sm:$0xf]  ;;  %s100_s18 = smov [#allocation5]  }
  0x13   :  { %v23_v1 = vmul.f32 %v21_v0, %v21_v0  ;;  %v22_v2 = vmul.f32 0.7978846, %v21_v0  ;;  %v27_v6 = vmul.f32 0.5, %v21_v0  ;;  %s38_s19 = sshll.u32 %s100_s18, 4  ;;  %s39_s19 = int_to_ptr.vmem [resolvable:$true] %s38_s19 }
  0x14   :  { %s73_s20 = scalar_lea.vmem %s39_s19, 64  ;;  %p78_p9 = scmp.lt.s32.totalorder %s39_s19, %s39_s19 }
  0x15   :  { %v24_v3 = vmul.f32 0.044715, %v23_v1  ;;  %p74_p8 = scmp.ne.s32.totalorder %s39_s19, %s73_s20  ;;  %p79_p10 = scmp.lt.s32.totalorder %s73_s20, %s73_s20 }
  0x17   :  { %v25_v4 = vadd.f32 1.0, %v24_v3  ;;  %p80_p11 = por %p79_p10, %p78_p9 }
  0x19   :  { %v26_v5 = vmul.f32 %v25_v4, %v22_v2  ;;  %p81_p12 = pnand %p80_p11, %p74_p8 }
  0x1b   :  { %49 = vtanh.f32 %v26_v5 }
  0x25   :  { %v50_v7 = vpop.eup %49 }
  0x26   :  { %v29_v8 = vadd.f32 1.0, %v50_v7 }
  0x28   :  { %v30_v9 = vmul.f32 %v29_v8, %v27_v6 }
  0x2a   :  { %31 = vst [vmem:[#allocation5] sm:$0xf] %v30_v9 }
  0x2b   :  { %84 = shalt.err (!%p81_p12)
}
  0x2c   :  { %s85_s22 = scalar_lea.hbm %s136_s1, 64 }
  0x2d   :  { %p86_p13 = scmp.ne.s32.totalorder %s136_s1, %s85_s22  ;;  %p89_p0 = scmp.lt.u32.totalorder %s85_s22, %s136_s1 }
  0x2f   :  { %p91_p1 = pnand %p89_p0, %p86_p13 }
  0x31   :  { %94 = shalt.err (!%p91_p1)
}
  0x32   :  { %41 = dma.vmem_to_hbm [thread:$0]  %s39_s19, 64, %s136_s1, [#allocation4]  }
  0x33   :  { %97 = dma.done.wait [#allocation4], 64  }
  0x34   :  { %98 = vsyncadd [#allocation4], 4294967232 }
  0x35   :  { %45 = vsyncpa [#allocation3], 1 }
  0x36   :  { %46 = vsyncpa [#allocation4], 1 }

</bundles_post_ra>
